<compile_context>
chip_gen: v5e
topology: v5e:2x2
jax: 0.10.0
libtpu: 0.0.40
codegen_flags: <defaults>
</compile_context>

<pallas_src>
import jax
import jax.numpy as jnp
from jax.experimental import pallas as pl
from jax.experimental.pallas import tpu as pltpu


def _round_up(n, m):
    return ((n + m - 1) // m) * m


# ----------------------------- kernels ---------------------------------------

def _fusion_fc_kernel(x_ref, c_ref, wx_ref, wc_ref, b_ref, o_ref):
    # out = concat(x, c, dim=1) @ W^T + b == x @ Wx + c @ Wc + b
    # Activations arrive in their original dtype; the cast to the compute
    # dtype happens here (in-register), not as a separate XLA pass over HBM.
    cdt = wx_ref.dtype
    acc = jnp.dot(x_ref[...].astype(cdt), wx_ref[...],
                  preferred_element_type=jnp.float32)
    acc = acc + jnp.dot(c_ref[...].astype(cdt), wc_ref[...],
                        preferred_element_type=jnp.float32)
    o_ref[...] = (acc + b_ref[...]).astype(o_ref.dtype)       # f32 bias add


def _fc_kernel(x_ref, w_ref, b_ref, o_ref):
    acc = jnp.dot(x_ref[...].astype(w_ref.dtype), w_ref[...],
                  preferred_element_type=jnp.float32)
    o_ref[...] = (acc + b_ref[...]).astype(o_ref.dtype)


# ------------------------- one-time parameter prep ---------------------------

def prepare_fusion_fc_params(weight, bias, dx, *, compute_dtype=jnp.bfloat16):
    """Call ONCE per Linear (fusion mode) and reuse across forward calls.

    weight: [Dout, Dx+Dc] (PyTorch layout), bias: [Dout].
    Returns (w_x [Dx, Dout], w_c [Dc, Dout], bias2d [1, Dout] f32).
    """
    dout, din = weight.shape
    assert 0 < dx < din, "fusion mode requires Din == Dx + Dc with Dc > 0"
    w = jnp.asarray(weight).astype(compute_dtype)
    w_x = w[:, :dx].T                                   # [Dx, Dout]
    w_c = w[:, dx:].T                                   # [Dc, Dout]
    b2d = jnp.asarray(bias).astype(jnp.float32).reshape(1, dout)
    return w_x, w_c, b2d


def prepare_fc_params(weight, bias, *, compute_dtype=jnp.bfloat16):
    """Call ONCE per Linear (non-fusion mode). weight: [Dout, Dx], bias: [Dout]."""
    dout, din = weight.shape
    w_t = jnp.asarray(weight).T.astype(compute_dtype)   # [Dx, Dout]
    b2d = jnp.asarray(bias).astype(jnp.float32).reshape(1, dout)
    return w_t, b2d


# ----------------------------- forward wrapper --------------------------------

def _choose_tm(B, block_b):
    # B <= 8: one full-batch block (block == full dim is always legal).
    # Otherwise: tiles as large as possible (<= block_b) to amortize the
    # ~0.35 us per-grid-step overhead (v5e/v6e), while guaranteeing >= 2
    # "parallel" batch tiles so both v7x TensorCores are used.
    if B <= 8:
        return B
    return min(block_b, _round_up(pl.cdiv(B, 2), 8))


def fusion_fc_forward(x, condition, params, *, if_fusion=True, block_b=512):
    """Forward pass of FusionFCModule with net = nn.Linear.

    x:         [B, Dx]   (any float dtype; cast in-kernel)
    condition: [B, Dc]
    params:    prepare_fusion_fc_params(...) if if_fusion else prepare_fc_params(...)
    """
    B, dx = x.shape
    tm = _choose_tm(B, block_b)
    grid = (pl.cdiv(B, tm),)          # ragged last block handled by Pallas
    compiler_params = pltpu.CompilerParams(
        dimension_semantics=("parallel",))

    if if_fusion:
        w_x, w_c, b2d = params
        dc = condition.shape[1]
        dout = b2d.shape[1]
        assert w_x.shape == (dx, dout) and w_c.shape == (dc, dout)
        return pl.pallas_call(
            _fusion_fc_kernel,
            out_shape=jax.ShapeDtypeStruct((B, dout), jnp.float32),
            grid_spec=pl.GridSpec(
                grid=grid,
                in_specs=[
                    pl.BlockSpec((tm, dx), lambda i: (i, 0)),
                    pl.BlockSpec((tm, dc), lambda i: (i, 0)),
                    # Constant index_map -> fetched once, VMEM-resident.
                    pl.BlockSpec((dx, dout), lambda i: (0, 0)),
                    pl.BlockSpec((dc, dout), lambda i: (0, 0)),
                    pl.BlockSpec((1, dout), lambda i: (0, 0)),
                ],
                out_specs=pl.BlockSpec((tm, dout), lambda i: (i, 0)),
            ),
            compiler_params=compiler_params,
        )(x, condition, w_x, w_c, b2d)
    else:
        w_t, b2d = params
        dout = b2d.shape[1]
        assert w_t.shape == (dx, dout)
        return pl.pallas_call(
            _fc_kernel,
            out_shape=jax.ShapeDtypeStruct((B, dout), jnp.float32),
            grid_spec=pl.GridSpec(
                grid=grid,
                in_specs=[
                    pl.BlockSpec((tm, dx), lambda i: (i, 0)),
                    pl.BlockSpec((dx, dout), lambda i: (0, 0)),
                    pl.BlockSpec((1, dout), lambda i: (0, 0)),
                ],
                out_specs=pl.BlockSpec((tm, dout), lambda i: (i, 0)),
            ),
            compiler_params=compiler_params,
        )(x, w_t, b2d)


# ----------------------------- main ------------------------------------------

if __name__ == "__main__":
    # B chosen non-divisible by the tile so the ragged-last-block path
    # (no wrapper pad, no post-kernel slice) is exercised; grid has 2
    # "parallel" batch tiles (pipelining / v7x dual-TC sharding).
    B, Dx, Dc, Dout = 250, 32, 16, 32
    Din = Dx + Dc

    key = jax.random.PRNGKey(0)
    kx, kc, kw, kb = jax.random.split(key, 4)

    x = jax.random.normal(kx, (B, Dx), dtype=jnp.float32)
    condition = jax.random.normal(kc, (B, Dc), dtype=jnp.float32)

    # Deterministic synthetic Linear(Din, Dout) parameters (PyTorch layout).
    bound = 1.0 / (Din ** 0.5)
    weight = jax.random.uniform(kw, (Dout, Din), minval=-bound, maxval=bound,
                                dtype=jnp.float32)
    bias = jax.random.uniform(kb, (Dout,), minval=-bound, maxval=bound,
                              dtype=jnp.float32)

    # ---- fusion path: cat((x, condition), dim=1) -> Linear ----
    fusion_params = prepare_fusion_fc_params(weight, bias, Dx)   # one-time prep
    out = fusion_fc_forward(x, condition, fusion_params, if_fusion=True)
    out = jax.block_until_ready(out)
    assert out.shape == (B, Dout)

    # Matched-precision reference (bf16 inputs/weights, exact f32 accumulation).
    xb = x.astype(jnp.bfloat16).astype(jnp.float32)
    cb = condition.astype(jnp.bfloat16).astype(jnp.float32)
    wb = weight.astype(jnp.bfloat16).astype(jnp.float32)
    ref = jnp.dot(jnp.concatenate([xb, cb], axis=1), wb.T,
                  precision=jax.lax.Precision.HIGHEST) + bias
    assert jnp.allclose(out, ref, atol=1e-3, rtol=1e-3)

    # ---- non-fusion path: Linear applied to x only ----
    w_nf = weight[:, :Dx]
    fc_params = prepare_fc_params(w_nf, bias)
    out2 = fusion_fc_forward(x, condition, fc_params, if_fusion=False)
    out2 = jax.block_until_ready(out2)
    ref2 = jnp.dot(xb, w_nf.astype(jnp.bfloat16).astype(jnp.float32).T,
                   precision=jax.lax.Precision.HIGHEST) + bias
    assert out2.shape == (B, Dout)
    assert jnp.allclose(out2, ref2, atol=1e-3, rtol=1e-3)

    print("KERNEL_OK")
</pallas_src>

<mosaic_0001>
module attributes {stable_mosaic.version = 11 : i64} {
  func.func @_fusion_fc_kernel(%arg0: i32, %arg1: memref<128x32xf32, #tpu.memory_space<vmem>>, %arg2: memref<128x16xf32, #tpu.memory_space<vmem>>, %arg3: memref<32x32xbf16, #tpu.memory_space<vmem>>, %arg4: memref<16x32xbf16, #tpu.memory_space<vmem>>, %arg5: memref<1x32xf32, #tpu.memory_space<vmem>>, %arg6: memref<128x32xf32, #tpu.memory_space<vmem>>) attributes {dimension_semantics = [#tpu.dimension_semantics<parallel>], iteration_bounds = array<i64: 2>, scalar_prefetch = 0 : i64, scratch_operands = 0 : i64, tpu.core_type = #tpu.core_type<tc>, window_params = [{transform_indices = @transform_0, window_bounds = array<i64: 128, 32>}, {transform_indices = @transform_1, window_bounds = array<i64: 128, 16>}, {pipeline_mode = #tpu.pipeline_mode<synchronous>, transform_indices = @transform_2, window_bounds = array<i64: 32, 32>}, {pipeline_mode = #tpu.pipeline_mode<synchronous>, transform_indices = @transform_3, window_bounds = array<i64: 16, 32>}, {pipeline_mode = #tpu.pipeline_mode<synchronous>, transform_indices = @transform_4, window_bounds = array<i64: 1, 32>}, {transform_indices = @transform_5, window_bounds = array<i64: 128, 32>}]} {
    %c0 = arith.constant 0 : index
    %c0_0 = arith.constant 0 : index
    %0 = vector.load %arg1[%c0, %c0_0] : memref<128x32xf32, #tpu.memory_space<vmem>>, vector<128x32xf32>
    %1 = arith.truncf %0 : vector<128x32xf32> to vector<128x32xbf16>
    %c0_1 = arith.constant 0 : index
    %c0_2 = arith.constant 0 : index
    %2 = vector.load %arg3[%c0_1, %c0_2] : memref<32x32xbf16, #tpu.memory_space<vmem>>, vector<32x32xbf16>
    %cst = arith.constant dense<0.000000e+00> : vector<128x32xf32>
    %3 = tpu.matmul %1, %2, %cst {dimension_numbers = #tpu.dot_dimension_numbers<[1], [0], [0], [1], [0, 0, 1, 1], [], []>} : vector<128x32xbf16>, vector<32x32xbf16>, vector<128x32xf32> -> vector<128x32xf32>
    %c0_3 = arith.constant 0 : index
    %c0_4 = arith.constant 0 : index
    %4 = vector.load %arg2[%c0_3, %c0_4] : memref<128x16xf32, #tpu.memory_space<vmem>>, vector<128x16xf32>
    %5 = arith.truncf %4 : vector<128x16xf32> to vector<128x16xbf16>
    %c0_5 = arith.constant 0 : index
    %c0_6 = arith.constant 0 : index
    %6 = vector.load %arg4[%c0_5, %c0_6] : memref<16x32xbf16, #tpu.memory_space<vmem>>, vector<16x32xbf16>
    %cst_7 = arith.constant dense<0.000000e+00> : vector<128x32xf32>
    %7 = tpu.matmul %5, %6, %cst_7 {dimension_numbers = #tpu.dot_dimension_numbers<[1], [0], [0], [1], [0, 0, 1, 1], [], []>} : vector<128x16xbf16>, vector<16x32xbf16>, vector<128x32xf32> -> vector<128x32xf32>
    %8 = arith.addf %3, %7 : vector<128x32xf32>
    %c0_8 = arith.constant 0 : index
    %c0_9 = arith.constant 0 : index
    %9 = vector.load %arg5[%c0_8, %c0_9] : memref<1x32xf32, #tpu.memory_space<vmem>>, vector<1x32xf32>
    %10 = vector.broadcast %9 : vector<1x32xf32> to vector<128x32xf32>
    %11 = arith.addf %8, %10 : vector<128x32xf32>
    %c0_10 = arith.constant 0 : index
    %c0_11 = arith.constant 0 : index
    %12 = vector.load %arg6[%c0_10, %c0_11] : memref<128x32xf32, #tpu.memory_space<vmem>>, vector<128x32xf32>
    tpu.vector_store %arg6[%c0_10, %c0_11], %11 {strides = array<i32>} : memref<128x32xf32, #tpu.memory_space<vmem>>, vector<128x32xf32>,
    return
  }
  func.func @transform_0(%arg0: i32) -> (i32, i32) {
    %c0_i32 = arith.constant 0 : i32
    %c0_i32_0 = arith.constant 0 : i32
    return %arg0, %c0_i32 : i32, i32
  }
  func.func @transform_1(%arg0: i32) -> (i32, i32) {
    %c0_i32 = arith.constant 0 : i32
    %c0_i32_0 = arith.constant 0 : i32
    return %arg0, %c0_i32 : i32, i32
  }
  func.func @transform_2(%arg0: i32) -> (i32, i32) {
    %c0_i32 = arith.constant 0 : i32
    %c0_i32_0 = arith.constant 0 : i32
    %c0_i32_1 = arith.constant 0 : i32
    return %c0_i32, %c0_i32_0 : i32, i32
  }
  func.func @transform_3(%arg0: i32) -> (i32, i32) {
    %c0_i32 = arith.constant 0 : i32
    %c0_i32_0 = arith.constant 0 : i32
    %c0_i32_1 = arith.constant 0 : i32
    return %c0_i32, %c0_i32_0 : i32, i32
  }
  func.func @transform_4(%arg0: i32) -> (i32, i32) {
    %c0_i32 = arith.constant 0 : i32
    %c0_i32_0 = arith.constant 0 : i32
    %c0_i32_1 = arith.constant 0 : i32
    return %c0_i32, %c0_i32_0 : i32, i32
  }
  func.func @transform_5(%arg0: i32) -> (i32, i32) {
    %c0_i32 = arith.constant 0 : i32
    %c0_i32_0 = arith.constant 0 : i32
    return %arg0, %c0_i32 : i32, i32
  }
}

</mosaic_0001>

<bundles_post_ra>
// kernel: tpu_custom_call.1
= control target key start
LH: loop header
LB: loop body
LE: loop exit
PB: predicated region body
PF: predicated region fallthrough
CT: control target
= control target key end

     0   :  { %s669_s18 = smov 0   ;;  %s816_s0 = inlined_call_operand.vmem [shape: f32[250,32], index: 0, kind: input, shape index: {}]   ;;  %s817_s1 = inlined_call_operand.vmem [shape: f32[250,16], index: 1, kind: input, shape index: {}]   ;;  %s818_s2 = inlined_call_operand.vmem [shape: bf16[32,32], index: 2, kind: input, shape index: {}]   ;;  %s819_s3 = inlined_call_operand.vmem [shape: bf16[16,32], index: 3, kind: input, shape index: {}]   ;;  %s820_s4 = inlined_call_operand.vmem [shape: f32[1,32], index: 4, kind: input, shape index: {}]   ;;  %s821_s5 = inlined_call_operand.vmem [shape: f32[250,32], index: 5, kind: output, shape index: {}]  }
   0x1 LB: > { %s575_s19 = sadd.s32 4294967295, %s637_s18   ;;  %p579_p0 = scmp.ge.s32.totalorder %s637_s18, 1  ;;  %s637_s18 = sphi %s669_s18, %s15_s18  }
   0x2   : > { %p199_p1 = scmp.lt.s32.totalorder %s637_s18, 3 }
   0x4   : > { %p200_p2 = pnand %p579_p0, %p199_p1 }
   0x5   : > { %s580_s24 = sshll.u32 (!%p200_p2), %s575_s19, 4 }
   0x6   : > { %203 = sbr.rel (%p200_p2) target bundleno = 220 (0xdc), region = 40  ;;  %p233_p3 = scmp.lt.s32.totalorder (!%p200_p2), %s580_s24, 31 }
   0xb   : > { %v617_v0 = vld [vmem:[%s818_s2 + $0x8] sm:$0xff]  ;;  %v618_v1 = vld [vmem:[%s819_s3] sm:$0xff]  ;;  %s823_s24 = smov (!%p233_p3, %s580_s24), 31  ;;  %vm311_vm0 = vcmask 130048   ;;  %vm397_vm1 = vcmask 261120  }
   0xc   : > { %428 = vmatpush.bf16.msra.mxu1 %v617_v0  ;;  %620 = vmatpush.bf16.msra.mxu2 %v617_v0  ;;  %v616_v2 = vld [vmem:[%s818_s2] sm:$0xff]  ;;  %s686_s27 = sshll.u32 %s823_s24, 3 }
   0xd   : > { %343 = vmatpush.bf16.msra.mxu0 %v618_v1  ;;  %619 = vmatpush.bf16.msra.mxu3 %v618_v1  ;;  %s692_s30 = scalar_lea.vmem %s817_s1, %s686_s27  ;;  %s698_s8 = scalar_lea.vmem %s816_s0, %s686_s27  ;;  %v751_v52 = vld [vmem:[%s820_s4] ss:$0 sm:$0xff] }
   0xe   : > { %v279_v3 = vld [vmem:[%s692_s30] sm:$0xff]  ;;  %v280_v4 = vld [vmem:[%s692_s30 + $0x8] sm:$0xff]  ;;  %v289_v12 = vld [vmem:[%s692_s30 + $0x50] sm:$0xff]  ;;  %s757_s13 = scalar_lea.vmem %s821_s5, %s686_s27 }
   0xf   : > { %v251_v5 = vld [vmem:[%s698_s8] sm:$0xff]  ;;  %v295_v6 = vpack.c.bf16 %v280_v4, %v279_v3  ;;  %v252_v7 = vld [vmem:[%s698_s8 + $0x8] sm:$0xff]  ;;  %v290_v13 = vld [vmem:[%s692_s30 + $0x58] sm:$0xff] }
  0x10   : > { %429 = vmatpush.bf16.msra.mxu1 %v616_v2  ;;  %621 = vmatpush.bf16.msra.mxu2 %v616_v2  ;;  %v259_v8 = vld [vmem:[%s698_s8 + $0x40] sm:$0xff]  ;;  %v260_v9 = vld [vmem:[%s698_s8 + $0x48] sm:$0xff]  ;;  %v267_v10 = vpack.c.bf16 %v252_v7, %v251_v5  ;;  %v300_v14 = vpack.c.bf16 %v290_v13, %v289_v12  ;;  %v281_v15 = vld [vmem:[%s692_s30 + $0x10] sm:$0xff] }
  0x11   : > { %v271_v11 = vpack.c.bf16 %v260_v9, %v259_v8  ;;  %590 = vmatmul.msk.bf16.vlgmr.msra.gmra.mxu0 %vm311_vm0, %v295_v6  ;;  %v282_v16 = vld [vmem:[%s692_s30 + $0x18] sm:$0xff]  ;;  %v253_v17 = vld [vmem:[%s698_s8 + $0x10] sm:$0xff]  ;;  %v291_v22 = vld [vmem:[%s692_s30 + $0x60] sm:$0xff] }
  0x12   : > { %595 = vmatmul.msk.bf16.vlgmr.msra.gmra.mxu3 %vm311_vm0, %v300_v14  ;;  %v254_v18 = vld [vmem:[%s698_s8 + $0x18] sm:$0xff]  ;;  %v261_v19 = vld [vmem:[%s698_s8 + $0x50] sm:$0xff]  ;;  %v296_v21 = vpack.c.bf16 %v282_v16, %v281_v15  ;;  %v292_v23 = vld [vmem:[%s692_s30 + $0x68] sm:$0xff] }
  0x13   : > { %606 = vmatmul.msk.bf16.vlgmr.msra.gmra.mxu1 %vm397_vm1, %v267_v10  ;;  %610 = vmatmul.msk.bf16.vlgmr.msra.gmra.mxu2 %vm397_vm1, %v271_v11  ;;  %v262_v20 = vld [vmem:[%s698_s8 + $0x58] sm:$0xff]  ;;  %v268_v24 = vpack.c.bf16 %v254_v18, %v253_v17  ;;  %v301_v26 = vpack.c.bf16 %v292_v23, %v291_v22  ;;  %v283_v27 = vld [vmem:[%s692_s30 + $0x20] sm:$0xff]  ;;  %v284_v28 = vld [vmem:[%s692_s30 + $0x28] sm:$0xff] }
  0x14   : > { %v272_v25 = vpack.c.bf16 %v262_v20, %v261_v19  ;;  %v255_v29 = vld [vmem:[%s698_s8 + $0x20] sm:$0xff]  ;;  %v256_v30 = vld [vmem:[%s698_s8 + $0x28] sm:$0xff]  ;;  %v297_v33 = vpack.c.bf16 %v284_v28, %v283_v27  ;;  %v293_v34 = vld [vmem:[%s692_s30 + $0x70] sm:$0xff] }
  0x15   : > { %v263_v31 = vld [vmem:[%s698_s8 + $0x60] sm:$0xff]  ;;  %v264_v32 = vld [vmem:[%s698_s8 + $0x68] sm:$0xff]  ;;  %v294_v35 = vld [vmem:[%s692_s30 + $0x78] sm:$0xff]  ;;  %v269_v36 = vpack.c.bf16 %v256_v30, %v255_v29 }
  0x16   : > { %v273_v37 = vpack.c.bf16 %v264_v32, %v263_v31  ;;  %v302_v38 = vpack.c.bf16 %v294_v35, %v293_v34  ;;  %v285_v39 = vld [vmem:[%s692_s30 + $0x30] sm:$0xff]  ;;  %v286_v40 = vld [vmem:[%s692_s30 + $0x38] sm:$0xff]  ;;  %v287_v48 = vld [vmem:[%s692_s30 + $0x40] sm:$0xff] }
  0x17   : > { %v257_v41 = vld [vmem:[%s698_s8 + $0x30] sm:$0xff]  ;;  %v258_v42 = vld [vmem:[%s698_s8 + $0x38] sm:$0xff]  ;;  %v298_v45 = vpack.c.bf16 %v286_v40, %v285_v39  ;;  %v288_v49 = vld [vmem:[%s692_s30 + $0x48] sm:$0xff] }
  0x18   : > { %v265_v43 = vld [vmem:[%s698_s8 + $0x70] sm:$0xff]  ;;  %v266_v44 = vld [vmem:[%s698_s8 + $0x78] sm:$0xff]  ;;  %v270_v46 = vpack.c.bf16 %v258_v42, %v257_v41  ;;  %v299_v50 = vpack.c.bf16 %v288_v49, %v287_v48 }
  0x19   : > { %v274_v47 = vpack.c.bf16 %v266_v44, %v265_v43 }
  0x21   : > { %591 = vmatmul.msk.bf16.gmra.mxu0 %vm311_vm0, %v296_v21 }
  0x22   : > { %596 = vmatmul.msk.bf16.gmra.mxu3 %vm311_vm0, %v301_v26 }
  0x23   : > { %607 = vmatmul.msk.bf16.gmra.mxu1 %vm397_vm1, %v268_v24  ;;  %611 = vmatmul.msk.bf16.gmra.mxu2 %vm397_vm1, %v272_v25 }
  0x31   : > { %592 = vmatmul.msk.bf16.gmra.mxu0 %vm311_vm0, %v297_v33 }
  0x32   : > { %597 = vmatmul.msk.bf16.gmra.mxu3 %vm311_vm0, %v302_v38 }
  0x33   : > { %608 = vmatmul.msk.bf16.gmra.mxu1 %vm397_vm1, %v269_v36  ;;  %612 = vmatmul.msk.bf16.gmra.mxu2 %vm397_vm1, %v273_v37 }
  0x41   : > { %593 = vmatmul.msk.bf16.gmra.mxu0 %vm311_vm0, %v298_v45 }
  0x43   : > { %609 = vmatmul.msk.bf16.gmra.mxu1 %vm397_vm1, %v270_v46  ;;  %613 = vmatmul.msk.bf16.gmra.mxu2 %vm397_vm1, %v274_v47 }
  0x51   : > { %594 = vmatmul.msk.bf16.gmra.mxu0 %vm311_vm0, %v299_v50 }
  0x8e   : > { %v345_v51 = vpop.f32.mrf.mxu0 }
  0x90   : > { %v431_v53 = vpop.f32.mrf.mxu1 }
  0x91   : > { %v432_v54 = vadd.f32 %v431_v53, %v345_v51 }
  0x93   : > { %v475_v55 = vadd.f32 %v751_v52, %v432_v54 }
  0x95   : > { %491 = vst.msk [vmem:[%s757_s13] sm:$0xff] %vm397_vm1, %v475_v55  ;;  %v370_v60 = vpop.f32.mrf.mxu3 }
  0x96   : > { %v762_v56 = vpop.f32.mrf.mxu2  ;;  %v347_v57 = vpop.f32.mrf.mxu0 }
  0x98   : > { %v433_v58 = vpop.f32.mrf.mxu1 }
  0x99   : > { %v434_v59 = vadd.f32 %v433_v58, %v347_v57 }
  0x9b   : > { %v476_v61 = vadd.f32 %v751_v52, %v434_v59 }
  0x9d   : > { %492 = vst.msk [vmem:[%s757_s13 + $0x8] sm:$0xff] %vm397_vm1, %v476_v61  ;;  %v372_v3 = vpop.f32.mrf.mxu3 }
  0x9e   : > { %v767_v62 = vpop.f32.mrf.mxu2  ;;  %v350_v63 = vpop.f32.mrf.mxu0 }
  0xa0   : > { %v436_v0 = vpop.f32.mrf.mxu1 }
  0xa1   : > { %v437_v1 = vadd.f32 %v436_v0, %v350_v63 }
  0xa3   : > { %v477_v2 = vadd.f32 %v751_v52, %v437_v1 }
  0xa5   : > { %493 = vst.msk [vmem:[%s757_s13 + $0x10] sm:$0xff] %vm397_vm1, %v477_v2  ;;  %v375_v12 = vpop.f32.mrf.mxu3 }
  0xa6   : > { %v456_v4 = vpop.f32.mrf.mxu2  ;;  %v352_v5 = vpop.f32.mrf.mxu0 }
  0xa7   : > { %v457_v6 = vadd.f32 %v456_v4, %v370_v60 }
  0xa8   : > { %v438_v7 = vpop.f32.mrf.mxu1 }
  0xa9   : > { %v439_v8 = vadd.f32 %v438_v7, %v352_v5  ;;  %v485_v9 = vadd.f32 %v751_v52, %v457_v6 }
  0xab   : > { %v478_v10 = vadd.f32 %v751_v52, %v439_v8  ;;  %501 = vst.msk [vmem:[%s757_s13 + $0x50] sm:$0xff] %vm397_vm1, %v485_v9 }
  0xad   : > { %494 = vst.msk [vmem:[%s757_s13 + $0x18] sm:$0xff] %vm397_vm1, %v478_v10  ;;  %v377_v23 = vpop.f32.mrf.mxu3 }
  0xae   : > { %v458_v11 = vpop.f32.mrf.mxu2  ;;  %v355_v13 = vpop.f32.mrf.mxu0 }
  0xaf   : > { %v459_v14 = vadd.f32 %v458_v11, %v372_v3 }
  0xb0   : > { %v441_v15 = vpop.f32.mrf.mxu1 }
  0xb1   : > { %v442_v16 = vadd.f32 %v441_v15, %v355_v13  ;;  %v486_v17 = vadd.f32 %v751_v52, %v459_v14 }
  0xb3   : > { %v479_v18 = vadd.f32 %v751_v52, %v442_v16  ;;  %502 = vst.msk [vmem:[%s757_s13 + $0x58] sm:$0xff] %vm397_vm1, %v486_v17 }
  0xb5   : > { %495 = vst.msk [vmem:[%s757_s13 + $0x20] sm:$0xff] %vm397_vm1, %v479_v18  ;;  %v380_v33 = vpop.f32.mrf.mxu3 }
  0xb6   : > { %v461_v19 = vpop.f32.mrf.mxu2  ;;  %v357_v20 = vpop.f32.mrf.mxu0 }
  0xb7   : > { %v462_v21 = vadd.f32 %v461_v19, %v375_v12 }
  0xb8   : > { %v443_v22 = vpop.f32.mrf.mxu1 }
  0xb9   : > { %v444_v24 = vadd.f32 %v443_v22, %v357_v20  ;;  %v487_v25 = vadd.f32 %v751_v52, %v462_v21 }
  0xbb   : > { %v480_v26 = vadd.f32 %v751_v52, %v444_v24  ;;  %503 = vst.msk [vmem:[%s757_s13 + $0x60] sm:$0xff] %vm397_vm1, %v487_v25 }
  0xbd   : > { %496 = vst.msk [vmem:[%s757_s13 + $0x28] sm:$0xff] %vm397_vm1, %v480_v26  ;;  %v382_v42 = vpop.f32.mrf.mxu3 }
  0xbe   : > { %v463_v27 = vpop.f32.mrf.mxu2  ;;  %v360_v28 = vpop.f32.mrf.mxu0 }
  0xbf   : > { %v464_v29 = vadd.f32 %v463_v27, %v377_v23 }
  0xc0   : > { %v446_v30 = vpop.f32.mrf.mxu1 }
  0xc1   : > { %v447_v31 = vadd.f32 %v446_v30, %v360_v28  ;;  %v488_v32 = vadd.f32 %v751_v52, %v464_v29 }
  0xc3   : > { %v481_v34 = vadd.f32 %v751_v52, %v447_v31  ;;  %504 = vst.msk [vmem:[%s757_s13 + $0x68] sm:$0xff] %vm397_vm1, %v488_v32 }
  0xc5   : > { %497 = vst.msk [vmem:[%s757_s13 + $0x30] sm:$0xff] %vm397_vm1, %v481_v34 }
  0xc6   : > { %v466_v35 = vpop.f32.mrf.mxu2  ;;  %v362_v36 = vpop.f32.mrf.mxu0 }
  0xc7   : > { %v467_v37 = vadd.f32 %v466_v35, %v380_v33 }
  0xc8   : > { %v448_v38 = vpop.f32.mrf.mxu1 }
  0xc9   : > { %v449_v39 = vadd.f32 %v448_v38, %v362_v36  ;;  %v489_v40 = vadd.f32 %v751_v52, %v467_v37 }
  0xcb   : > { %v482_v41 = vadd.f32 %v751_v52, %v449_v39  ;;  %505 = vst.msk [vmem:[%s757_s13 + $0x70] sm:$0xff] %vm397_vm1, %v489_v40 }
  0xcd   : > { %498 = vst.msk [vmem:[%s757_s13 + $0x38] sm:$0xff] %vm397_vm1, %v482_v41 }
  0xce   : > { %v468_v43 = vpop.f32.mrf.mxu2  ;;  %v365_v44 = vpop.f32.mrf.mxu0 }
  0xcf   : > { %v469_v45 = vadd.f32 %v468_v43, %v382_v42  ;;  %v452_v46 = vadd.f32 %v762_v56, %v365_v44 }
  0xd1   : > { %v490_v47 = vadd.f32 %v751_v52, %v469_v45  ;;  %v483_v48 = vadd.f32 %v751_v52, %v452_v46 }
  0xd3   : > { %506 = vst.msk [vmem:[%s757_s13 + $0x78] sm:$0xff] %vm397_vm1, %v490_v47 }
  0xd4   : > { %499 = vst.msk [vmem:[%s757_s13 + $0x40] sm:$0xff] %vm397_vm1, %v483_v48 }
  0xd6   : > { %v367_v49 = vpop.f32.mrf.mxu0 }
  0xd7   : > { %v454_v50 = vadd.f32 %v767_v62, %v367_v49 }
  0xd9   : > { %v484_v51 = vadd.f32 %v751_v52, %v454_v50 }
  0xdb   : > { %500 = vst.msk [vmem:[%s757_s13 + $0x48] sm:$0xff] %vm397_vm1, %v484_v51 }
  0xdc PF: > { %s15_s18 = sadd.s32 1, %s637_s18  }
  0xdd   : > { %p12_p4 = scmp.ge.s32.totalorder %s15_s18, 4  }
  0xdf   :  { %14 = sbr.rel (!%p12_p4) target bundleno = 1 (0x1), region = 73 }

</bundles_post_ra>
